<compile_context>
chip_gen: v5e
topology: v5e:2x2
jax: 0.10.0
libtpu: 0.0.40
codegen_flags: <defaults>
</compile_context>

<pallas_src>
import functools
import math

import jax
import jax.numpy as jnp
import numpy as np
from jax import lax
from jax.experimental import pallas as pl
from jax.experimental.pallas import tpu as pltpu

_VMEM_LIMIT = 32 * 1024 * 1024  # fits v5e/v6e/v7x scoped-VMEM budgets


def _round_up(x, m):
    return (x + m - 1) // m * m


def _pick_tile(dim, desired, align):
    """Largest aligned tile <= desired; prefer one dividing dim (no padding)."""
    if dim <= desired:
        return _round_up(dim, align)
    for t in range(desired, align - 1, -align):
        if dim % t == 0:
            return t
    return desired


# ----------------------------------------------------------------------------
# Tiled, pipelined linear:  y = x @ w   (f32 accumulation)
# ----------------------------------------------------------------------------
def _linear_kernel(x_ref, w_ref, o_ref, acc_ref):
    k = pl.program_id(2)
    prod = jnp.dot(x_ref[...], w_ref[...], preferred_element_type=jnp.float32)

    @pl.when(k == 0)
    def _first():
        acc_ref[...] = prod          # direct write: no zero-fill + add

    @pl.when(k > 0)
    def _accum():
        acc_ref[...] += prod

    @pl.when(k == pl.num_programs(2) - 1)
    def _finalize():
        o_ref[...] = acc_ref[...].astype(o_ref.dtype)


def pallas_linear(x2d, w, *, out_dtype=None, tm=512, tn=512, tk=512):
    """x2d: (M, K), w: (K, N) -> (M, N) in out_dtype (default: x dtype)."""
    M, K = x2d.shape
    K2, N = w.shape
    assert K == K2
    out_dtype = out_dtype if out_dtype is not None else x2d.dtype
    tm = _pick_tile(M, tm, 8)
    tk = _pick_tile(K, tk, 128)
    tn = _pick_tile(N, tn, 128)
    Mp, Kp, Np = _round_up(M, tm), _round_up(K, tk), _round_up(N, tn)
    # Pads are skipped entirely for tile-aligned model dims (no extra HBM pass).
    xp = x2d if (Mp == M and Kp == K) else jnp.pad(x2d, ((0, Mp - M), (0, Kp - K)))
    wp = w if (Kp == K and Np == N) else jnp.pad(w, ((0, Kp - K), (0, Np - N)))

    out = pl.pallas_call(
        _linear_kernel,
        out_shape=jax.ShapeDtypeStruct((Mp, Np), out_dtype),
        grid=(Mp // tm, Np // tn, Kp // tk),
        in_specs=[pl.BlockSpec((tm, tk), lambda i, j, k: (i, k)),
                  pl.BlockSpec((tk, tn), lambda i, j, k: (k, j))],
        out_specs=pl.BlockSpec((tm, tn), lambda i, j, k: (i, j)),
        scratch_shapes=[pltpu.VMEM((tm, tn), jnp.float32)],
        compiler_params=pltpu.CompilerParams(
            dimension_semantics=("parallel", "parallel", "arbitrary"),
            vmem_limit_bytes=_VMEM_LIMIT),
    )(xp, wp)
    if Mp != M or Np != N:
        out = out[:M, :N]
    return out


# ----------------------------------------------------------------------------
# Flash-style multi-head attention (heads packed along the feature/lane axis)
# ----------------------------------------------------------------------------
def _flash_step(q, k, v, mask, o_ref, m_sc, l_sc, acc_sc, num_heads):
    """One (tq, tk) tile of online-softmax attention for all heads.

    q: (tq, nh) pre-scaled, k/v: (tk, nh), mask: (tq, tk) bool or None.
    Scratch: m_sc/l_sc (H, tq, 1) f32, acc_sc (H, tq, dh) f32 persist across the
    kv grid axis (pl.program_id(2)).
    """
    ki = pl.program_id(2)

    @pl.when(ki == 0)
    def _init():
        m_sc[...] = jnp.full_like(m_sc, -jnp.inf)
        l_sc[...] = jnp.zeros_like(l_sc)
        acc_sc[...] = jnp.zeros_like(acc_sc)

    nh = q.shape[-1]
    dh = nh // num_heads
    neg = jnp.float32(-1000000.0)
    # TODO(synk): per-head lane slices are vreg-aligned only when dh % 128 == 0
    # (true for production configs); a batched dot_general / per-head grid axis
    # would remove relayouts for tiny dh like the demo's.
    for h in range(num_heads):
        sl = slice(h * dh, (h + 1) * dh)
        s = lax.dot_general(q[:, sl], k[:, sl],
                            dimension_numbers=(((1,), (1,)), ((), ())),
                            preferred_element_type=jnp.float32)
        if mask is not None:
            s = jnp.where(mask, s, neg)
        m_prev = m_sc[h]
        m_new = jnp.maximum(m_prev, jnp.max(s, axis=-1, keepdims=True))
        alpha = jnp.exp(m_prev - m_new)
        p = jnp.exp(s - m_new)
        l_sc[h] = alpha * l_sc[h] + jnp.sum(p, axis=-1, keepdims=True)
        # TODO(synk): nn.Dropout on the attention weights is identity in eval
        # mode; training-mode dropout is not implemented.
        acc_sc[h] = alpha * acc_sc[h] + jnp.dot(
            p.astype(v.dtype), v[:, sl], preferred_element_type=jnp.float32)
        m_sc[h] = m_new

    @pl.when(ki == pl.num_programs(2) - 1)
    def _finalize():
        outs = []
        for h in range(num_heads):
            lsum = l_sc[h]
            r = pl.reciprocal(lsum, approx=True)   # EUP slot (otherwise idle)
            r = r * (2.0 - lsum * r)               # one Newton step -> ~f32 exact
            outs.append(acc_sc[h] * r)
        o_ref[0] = jnp.concatenate(outs, axis=-1).astype(o_ref.dtype)


def _attn_kernel_nomask(q_ref, k_ref, v_ref, o_ref, m_sc, l_sc, acc_sc, *, num_heads):
    _flash_step(q_ref[0], k_ref[0], v_ref[0], None, o_ref, m_sc, l_sc, acc_sc, num_heads)


def _attn_kernel_batch_vl(vl_ref, q_ref, k_ref, v_ref, o_ref, m_sc, l_sc, acc_sc,
                          *, num_heads):
    # vl_ref: SMEM (B,) int32 -- one valid length per batch element.
    q, k, v = q_ref[0], k_ref[0], v_ref[0]
    tq, tk = q.shape[0], k.shape[0]
    col = lax.broadcasted_iota(jnp.int32, (tq, tk), 1) + pl.program_id(2) * tk
    mask = col < vl_ref[pl.program_id(0)]
    _flash_step(q, k, v, mask, o_ref, m_sc, l_sc, acc_sc, num_heads)


def _attn_kernel_query_vl(q_ref, k_ref, v_ref, vl_ref, o_ref, m_sc, l_sc, acc_sc,
                          *, num_heads):
    # vl_ref: VMEM (1, tq, 1) int32 -- per-query valid lengths.
    q, k, v = q_ref[0], k_ref[0], v_ref[0]
    tq, tk = q.shape[0], k.shape[0]
    col = lax.broadcasted_iota(jnp.int32, (tq, tk), 1) + pl.program_id(2) * tk
    mask = col < vl_ref[0]
    _flash_step(q, k, v, mask, o_ref, m_sc, l_sc, acc_sc, num_heads)


def pallas_multi_head_dot_attention(q, k, v, valid_lens, num_heads, num_hiddens,
                                    *, feature_blocks=(0, 0, 0), out_dtype=None,
                                    tq=256, tk=256):
    """q: (B, Lq, F) pre-scaled, k/v: (B, Lk, F) -> (B, Lq, num_hiddens).

    feature_blocks selects which nh-wide feature block of each input holds the
    projected Q/K/V (zero-copy split of a fused (B, L, 3*nh) qkv tensor)."""
    B, Lq, _ = q.shape
    _, Lk, _ = k.shape
    nh = num_hiddens
    dh = nh // num_heads
    out_dtype = out_dtype if out_dtype is not None else q.dtype
    fq, fk, fv = feature_blocks

    tq = min(tq, _round_up(Lq, 8))
    tk = min(tk, _round_up(Lk, 8))
    Lqp, Lkp = _round_up(Lq, tq), _round_up(Lk, tk)

    same = (q is k) and (k is v) and (Lqp == Lkp)
    if same:
        if Lqp != Lq:
            q = jnp.pad(q, ((0, 0), (0, Lqp - Lq), (0, 0)))
        k = v = q
    else:
        if Lqp != Lq:
            q = jnp.pad(q, ((0, 0), (0, Lqp - Lq), (0, 0)))
        if Lkp != Lk:
            k = jnp.pad(k, ((0, 0), (0, Lkp - Lk), (0, 0)))
            v = jnp.pad(v, ((0, 0), (0, Lkp - Lk), (0, 0)))

    grid = (B, Lqp // tq, Lkp // tk)
    out_shape = jax.ShapeDtypeStruct((B, Lqp, nh), out_dtype)
    scratch = [pltpu.VMEM((num_heads, tq, 1), jnp.float32),
               pltpu.VMEM((num_heads, tq, 1), jnp.float32),
               pltpu.VMEM((num_heads, tq, dh), jnp.float32)]
    cparams = pltpu.CompilerParams(
        dimension_semantics=("parallel", "parallel", "arbitrary"),
        vmem_limit_bytes=_VMEM_LIMIT)

    if valid_lens is not None and valid_lens.ndim == 2:
        # Per-query valid lengths (int32 compares; lane-width-1 input is tiny).
        vl = valid_lens.astype(jnp.int32)
        if Lqp != Lq:
            vl = jnp.pad(vl, ((0, 0), (0, Lqp - Lq)))
        vl3 = vl.reshape(B, Lqp, 1)
        kernel = functools.partial(_attn_kernel_query_vl, num_heads=num_heads)
        out = pl.pallas_call(
            kernel, out_shape=out_shape, grid=grid,
            in_specs=[pl.BlockSpec((1, tq, nh), lambda b, i, j: (b, i, fq)),
                      pl.BlockSpec((1, tk, nh), lambda b, i, j: (b, j, fk)),
                      pl.BlockSpec((1, tk, nh), lambda b, i, j: (b, j, fv)),
                      pl.BlockSpec((1, tq, 1), lambda b, i, j: (b, i, 0))],
            out_specs=pl.BlockSpec((1, tq, nh), lambda b, i, j: (b, i, 0)),
            scratch_shapes=scratch, compiler_params=cparams,
        )(q, k, v, vl3)
    elif valid_lens is None and Lkp == Lk:
        # No masking at all: dedicated kernel skips the iota/compare/where.
        kernel = functools.partial(_attn_kernel_nomask, num_heads=num_heads)
        out = pl.pallas_call(
            kernel, out_shape=out_shape, grid=grid,
            in_specs=[pl.BlockSpec((1, tq, nh), lambda b, i, j: (b, i, fq)),
                      pl.BlockSpec((1, tk, nh), lambda b, i, j: (b, j, fk)),
                      pl.BlockSpec((1, tk, nh), lambda b, i, j: (b, j, fv))],
            out_specs=pl.BlockSpec((1, tq, nh), lambda b, i, j: (b, i, 0)),
            scratch_shapes=scratch, compiler_params=cparams,
        )(q, k, v)
    else:
        # Per-batch valid lengths live in SMEM via scalar prefetch.  Also used
        # for valid_lens=None when Lk was padded (vl=Lk masks padded keys).
        vl = (jnp.full((B,), Lk, dtype=jnp.int32) if valid_lens is None
              else valid_lens.astype(jnp.int32))
        kernel = functools.partial(_attn_kernel_batch_vl, num_heads=num_heads)
        out = pl.pallas_call(
            kernel, out_shape=out_shape,
            grid_spec=pltpu.PrefetchScalarGridSpec(
                num_scalar_prefetch=1, grid=grid,
                in_specs=[pl.BlockSpec((1, tq, nh), lambda b, i, j, vlr: (b, i, fq)),
                          pl.BlockSpec((1, tk, nh), lambda b, i, j, vlr: (b, j, fk)),
                          pl.BlockSpec((1, tk, nh), lambda b, i, j, vlr: (b, j, fv))],
                out_specs=pl.BlockSpec((1, tq, nh), lambda b, i, j, vlr: (b, i, 0)),
                scratch_shapes=scratch),
            compiler_params=cparams,
        )(vl, q, k, v)

    if Lqp != Lq:
        out = out[:, :Lq]
    return out


# ----------------------------------------------------------------------------
# Full forward pass
# ----------------------------------------------------------------------------
def multi_head_attention(queries, keys, values, valid_lens, params, num_heads,
                         *, compute_dtype=jnp.bfloat16, fuse_qkv=None,
                         attn_tq=256, attn_tk=256):
    Wq, Wk, Wv, Wo = params
    B, Lq, _ = queries.shape
    _, Lk, _ = keys.shape
    nh = Wq.shape[1]
    dh = nh // num_heads
    cdt = jnp.dtype(compute_dtype)

    # Fold the 1/sqrt(dh) score scale into the query projection weight.
    Wq_s = (Wq * jnp.float32(1.0 / math.sqrt(dh))).astype(cdt)
    Wk_c, Wv_c, Wo_c = Wk.astype(cdt), Wv.astype(cdt), Wo.astype(cdt)

    if fuse_qkv is None:
        # NOTE: the identity check fails under jit tracing (distinct tracers);
        # jitted self-attention callers should pass fuse_qkv=True explicitly.
        fuse_qkv = (queries is keys) and (keys is values)

    if fuse_qkv:
        # Self-attention: one fused matmul for Q|K|V (activations read once,
        # MXU sees a 3x wider N).
        x = queries.astype(cdt).reshape(B * Lq, -1)
        W_qkv = jnp.concatenate([Wq_s, Wk_c, Wv_c], axis=1)            # (F, 3*nh)
        qkv = pallas_linear(x, W_qkv, out_dtype=cdt).reshape(B, Lq, 3 * nh)
        if nh % 128 == 0:
            # Zero-copy split: attention BlockSpecs index feature block 0/1/2
            # of the same (B, L, 3*nh) tensor -- no HBM slices.
            q_a = k_a = v_a = qkv
            fblocks = (0, 1, 2)
        else:
            # Small/unaligned nh (demo): lane-aligned blocks need full-width
            # features, so fall back to explicit slices.
            q_a = qkv[..., :nh]
            k_a = qkv[..., nh:2 * nh]
            v_a = qkv[..., 2 * nh:]
            fblocks = (0, 0, 0)
    else:
        q_a = pallas_linear(queries.astype(cdt).reshape(B * Lq, -1), Wq_s,
                            out_dtype=cdt).reshape(B, Lq, nh)
        k_a = pallas_linear(keys.astype(cdt).reshape(B * Lk, -1), Wk_c,
                            out_dtype=cdt).reshape(B, Lk, nh)
        v_a = pallas_linear(values.astype(cdt).reshape(B * Lk, -1), Wv_c,
                            out_dtype=cdt).reshape(B, Lk, nh)
        fblocks = (0, 0, 0)

    # Heads stay packed along the feature (lane) axis; per-head split/merge
    # happens inside the kernel, so no transpose_qkv/transpose_output HBM passes.
    out = pallas_multi_head_dot_attention(
        q_a, k_a, v_a, valid_lens, num_heads, nh,
        feature_blocks=fblocks, out_dtype=cdt, tq=attn_tq, tk=attn_tk)
    return pallas_linear(out.reshape(B * Lq, nh), Wo_c,
                         out_dtype=jnp.float32).reshape(B, Lq, nh)


# ----------------------------------------------------------------------------
# Pure-JAX reference (mirrors the PyTorch forward exactly, f32)
# ----------------------------------------------------------------------------
def transpose_qkv(x, num_heads):
    B, L, nh = x.shape
    x = x.reshape(B, L, num_heads, nh // num_heads)
    x = jnp.transpose(x, (0, 2, 1, 3))
    return x.reshape(B * num_heads, L, nh // num_heads)


def transpose_output(x, num_heads):
    BH, L, dh = x.shape
    x = x.reshape(BH // num_heads, num_heads, L, dh)
    x = jnp.transpose(x, (0, 2, 1, 3))
    return x.reshape(x.shape[0], L, num_heads * dh)


def reference_mha(queries, keys, values, valid_lens, params, num_heads):
    Wq, Wk, Wv, Wo = params
    B, Lq, _ = queries.shape
    _, Lk, _ = keys.shape
    nh = Wq.shape[1]
    dh = nh // num_heads

    q = transpose_qkv(queries @ Wq, num_heads)
    k = transpose_qkv(keys @ Wk, num_heads)
    v = transpose_qkv(values @ Wv, num_heads)

    scores = jnp.einsum('bqd,bkd->bqk', q, k) / math.sqrt(dh)
    if valid_lens is not None:
        vlh = jnp.repeat(valid_lens, num_heads, axis=0)
        if vlh.ndim == 1:
            vl = vlh[:, None, None].astype(jnp.float32)
        else:
            vl = vlh.reshape(B * num_heads, Lq, 1).astype(jnp.float32)
        col = jnp.arange(Lk, dtype=jnp.float32)[None, None, :]
        scores = jnp.where(col < vl, scores, -1000000.0)
    w = jax.nn.softmax(scores, axis=-1)
    out = jnp.einsum('bqk,bkd->bqd', w, v)
    out_concat = transpose_output(out, num_heads)
    return out_concat @ Wo


# ----------------------------------------------------------------------------
def init_params(key, query_size, key_size, value_size, num_hiddens):
    """Deterministic nn.Linear(bias=False)-style init; weights stored (in, out)."""
    ks = jax.random.split(key, 4)

    def lin(k, fan_in, fan_out):
        bound = 1.0 / math.sqrt(fan_in)
        return jax.random.uniform(k, (fan_in, fan_out), jnp.float32,
                                  minval=-bound, maxval=bound)

    Wq = lin(ks[0], query_size, num_hiddens)
    Wk = lin(ks[1], key_size, num_hiddens)
    Wv = lin(ks[2], value_size, num_hiddens)
    Wo = lin(ks[3], num_hiddens, num_hiddens)
    return Wq, Wk, Wv, Wo


if __name__ == "__main__":
    B, Lq, Lk = 2, 8, 8
    query_size = key_size = value_size = 16
    num_hiddens, num_heads = 32, 4

    root = jax.random.PRNGKey(0)
    kq, kk, kv, kp = jax.random.split(root, 4)
    queries = jax.random.normal(kq, (B, Lq, query_size), jnp.float32)
    keys = jax.random.normal(kk, (B, Lk, key_size), jnp.float32)
    values = jax.random.normal(kv, (B, Lk, value_size), jnp.float32)
    valid_lens = jnp.array([3, 6], dtype=jnp.int32)
    params = init_params(kp, query_size, key_size, value_size, num_hiddens)

    def check(out, ref, rtol, atol):
        np.testing.assert_allclose(np.asarray(jax.block_until_ready(out)),
                                   np.asarray(ref), rtol=rtol, atol=atol)

    f32 = jnp.float32

    # 1) 1-D valid_lens (SMEM scalar-prefetch mask), f32 compute -> tight check
    out = multi_head_attention(queries, keys, values, valid_lens, params,
                               num_heads, compute_dtype=f32)
    ref = reference_mha(queries, keys, values, valid_lens, params, num_heads)
    check(out, ref, 5e-4, 5e-4)

    # 2) 2-D per-query valid_lens
    valid_lens_2d = jnp.tile(jnp.arange(1, Lq + 1, dtype=jnp.int32)[None, :], (B, 1))
    out = multi_head_attention(queries, keys, values, valid_lens_2d, params,
                               num_heads, compute_dtype=f32)
    ref = reference_mha(queries, keys, values, valid_lens_2d, params, num_heads)
    check(out, ref, 5e-4, 5e-4)

    # 3) None valid_lens (dedicated no-mask kernel variant)
    out = multi_head_attention(queries, keys, values, None, params,
                               num_heads, compute_dtype=f32)
    ref = reference_mha(queries, keys, values, None, params, num_heads)
    check(out, ref, 5e-4, 5e-4)

    # 4) Self-attention (fused QKV projection; sliced split since nh % 128 != 0)
    out = multi_head_attention(queries, queries, queries, valid_lens, params,
                               num_heads, compute_dtype=f32)
    ref = reference_mha(queries, queries, queries, valid_lens, params, num_heads)
    check(out, ref, 5e-4, 5e-4)

    # 5) Fused self-attention with nh % 128 == 0 (zero-copy BlockSpec feature split)
    nh2, heads2 = 128, 4
    params2 = init_params(jax.random.PRNGKey(1), query_size, key_size, value_size, nh2)
    out = multi_head_attention(queries, queries, queries, valid_lens, params2,
                               heads2, compute_dtype=f32)
    ref = reference_mha(queries, queries, queries, valid_lens, params2, heads2)
    check(out, ref, 5e-4, 5e-4)

    # 6) Flash tiling exercised: multi-step kv/q grid, per-batch mask
    Lq2 = Lk2 = 32
    kq2, kk2, kv2 = jax.random.split(jax.random.PRNGKey(2), 3)
    q2 = jax.random.normal(kq2, (B, Lq2, query_size), jnp.float32)
    k2 = jax.random.normal(kk2, (B, Lk2, key_size), jnp.float32)
    v2 = jax.random.normal(kv2, (B, Lk2, value_size), jnp.float32)
    vlen2 = jnp.array([7, 25], dtype=jnp.int32)
    out = multi_head_attention(q2, k2, v2, vlen2, params, num_heads,
                               compute_dtype=f32, attn_tq=8, attn_tk=8)
    ref = reference_mha(q2, k2, v2, vlen2, params, num_heads)
    check(out, ref, 5e-4, 5e-4)

    # 7) Flash tiling with 2-D per-query valid_lens
    vlen2d = jnp.tile(jnp.arange(1, Lq2 + 1, dtype=jnp.int32)[None, :], (B, 1))
    out = multi_head_attention(q2, k2, v2, vlen2d, params, num_heads,
                               compute_dtype=f32, attn_tq=8, attn_tk=8)
    ref = reference_mha(q2, k2, v2, vlen2d, params, num_heads)
    check(out, ref, 5e-4, 5e-4)

    # 8) bf16 compute path (MXU-native operands, f32 accumulation) -> loose check
    out = multi_head_attention(queries, keys, values, valid_lens, params,
                               num_heads, compute_dtype=jnp.bfloat16)
    ref = reference_mha(queries, keys, values, valid_lens, params, num_heads)
    check(out, ref, 5e-2, 5e-2)

    print("KERNEL_OK")
</pallas_src>

<mosaic_0001>
module attributes {stable_mosaic.version = 11 : i64} {
  func.func @_linear_kernel(%arg0: i32, %arg1: i32, %arg2: i32, %arg3: memref<16x128xf32, #tpu.memory_space<vmem>>, %arg4: memref<128x128xf32, #tpu.memory_space<vmem>>, %arg5: memref<16x128xf32, #tpu.memory_space<vmem>>, %arg6: memref<16x128xf32, #tpu.memory_space<vmem>>) attributes {dimension_semantics = [#tpu.dimension_semantics<parallel>, #tpu.dimension_semantics<parallel>, #tpu.dimension_semantics<arbitrary>], iteration_bounds = array<i64: 1, 1, 1>, scalar_prefetch = 0 : i64, scratch_operands = 1 : i64, tpu.core_type = #tpu.core_type<tc>, window_params = [{transform_indices = @transform_0, window_bounds = array<i64: 16, 128>}, {transform_indices = @transform_1, window_bounds = array<i64: 128, 128>}, {transform_indices = @transform_2, window_bounds = array<i64: 16, 128>}]} {
    %c0 = arith.constant 0 : index
    %c0_0 = arith.constant 0 : index
    %0 = vector.load %arg3[%c0, %c0_0] : memref<16x128xf32, #tpu.memory_space<vmem>>, vector<16x128xf32>
    %c0_1 = arith.constant 0 : index
    %c0_2 = arith.constant 0 : index
    %1 = vector.load %arg4[%c0_1, %c0_2] : memref<128x128xf32, #tpu.memory_space<vmem>>, vector<128x128xf32>
    %cst = arith.constant dense<0.000000e+00> : vector<16x128xf32>
    %2 = tpu.matmul %0, %1, %cst {dimension_numbers = #tpu.dot_dimension_numbers<[1], [0], [0], [1], [0, 0, 1, 1], [], []>} : vector<16x128xf32>, vector<128x128xf32>, vector<16x128xf32> -> vector<16x128xf32>
    %c0_i32 = arith.constant 0 : i32
    %3 = arith.cmpi eq, %arg2, %c0_i32 : i32
    %4 = arith.extui %3 : i1 to i32
    %c0_i32_3 = arith.constant 0 : i32
    %5 = arith.cmpi ne, %4, %c0_i32_3 : i32
    scf.if %5 {
      %c0_8 = arith.constant 0 : index
      %c0_9 = arith.constant 0 : index
      %12 = vector.load %arg6[%c0_8, %c0_9] : memref<16x128xf32, #tpu.memory_space<vmem>>, vector<16x128xf32>
      tpu.vector_store %arg6[%c0_8, %c0_9], %2 {strides = array<i32>} : memref<16x128xf32, #tpu.memory_space<vmem>>, vector<16x128xf32>,
    } else {
    }
    %c0_i32_4 = arith.constant 0 : i32
    %6 = arith.cmpi sgt, %arg2, %c0_i32_4 : i32
    %7 = arith.extui %6 : i1 to i32
    %c0_i32_5 = arith.constant 0 : i32
    %8 = arith.cmpi ne, %7, %c0_i32_5 : i32
    scf.if %8 {
      %c0_8 = arith.constant 0 : index
      %c0_9 = arith.constant 0 : index
      %12 = vector.load %arg6[%c0_8, %c0_9] : memref<16x128xf32, #tpu.memory_space<vmem>>, vector<16x128xf32>
      %13 = arith.addf %12, %2 : vector<16x128xf32>
      %c0_10 = arith.constant 0 : index
      %c0_11 = arith.constant 0 : index
      %14 = vector.load %arg6[%c0_10, %c0_11] : memref<16x128xf32, #tpu.memory_space<vmem>>, vector<16x128xf32>
      tpu.vector_store %arg6[%c0_10, %c0_11], %13 {strides = array<i32>} : memref<16x128xf32, #tpu.memory_space<vmem>>, vector<16x128xf32>,
    } else {
    }
    %c0_i32_6 = arith.constant 0 : i32
    %9 = arith.cmpi eq, %arg2, %c0_i32_6 : i32
    %10 = arith.extui %9 : i1 to i32
    %c0_i32_7 = arith.constant 0 : i32
    %11 = arith.cmpi ne, %10, %c0_i32_7 : i32
    scf.if %11 {
      %c0_8 = arith.constant 0 : index
      %c0_9 = arith.constant 0 : index
      %12 = vector.load %arg6[%c0_8, %c0_9] : memref<16x128xf32, #tpu.memory_space<vmem>>, vector<16x128xf32>
      %c0_10 = arith.constant 0 : index
      %c0_11 = arith.constant 0 : index
      %13 = vector.load %arg5[%c0_10, %c0_11] : memref<16x128xf32, #tpu.memory_space<vmem>>, vector<16x128xf32>
      tpu.vector_store %arg5[%c0_10, %c0_11], %12 {strides = array<i32>} : memref<16x128xf32, #tpu.memory_space<vmem>>, vector<16x128xf32>,
    } else {
    }
    return
  }
  func.func @transform_0(%arg0: i32, %arg1: i32, %arg2: i32) -> (i32, i32) {
    %c0_i32 = arith.constant 0 : i32
    return %arg0, %arg2 : i32, i32
  }
  func.func @transform_1(%arg0: i32, %arg1: i32, %arg2: i32) -> (i32, i32) {
    %c0_i32 = arith.constant 0 : i32
    return %arg2, %arg1 : i32, i32
  }
  func.func @transform_2(%arg0: i32, %arg1: i32, %arg2: i32) -> (i32, i32) {
    %c0_i32 = arith.constant 0 : i32
    return %arg0, %arg1 : i32, i32
  }
}

</mosaic_0001>

<bundles_post_ra>
// kernel: tpu_custom_call.1
= control target key start
LH: loop header
LB: loop body
LE: loop exit
PB: predicated region body
PF: predicated region fallthrough
CT: control target
= control target key end

     0   :  { %7 = vsyncpa [#allocation4], 0  ;;  %s265_s0 = inlined_call_operand.hbm [shape: f32[16,128], index: 0, kind: input, shape index: {}]   ;;  %s266_s1 = inlined_call_operand.hbm [shape: f32[128,128], index: 1, kind: input, shape index: {}]   ;;  %s267_s2 = inlined_call_operand.hbm [shape: f32[16,128], index: 2, kind: output, shape index: {}]  }
   0x1   :  { %8 = vsyncpa [#allocation7], 0 }
   0x2   :  { %9 = vsyncpa [#allocation5], 0  ;;  %s14_s11 = sshll.u32 %s265_s0, 4  ;;  %s227_s12 = smov [#allocation3]   ;;  %s15_s11 = int_to_ptr.hbm [resolvable:$true] %s14_s11 }
   0x3   :  { %s16_s13 = sshll.u32 %s227_s12, 4  ;;  %s27_s16 = sshll.u32 %s266_s1, 4  ;;  %s17_s13 = int_to_ptr.vmem [resolvable:$true] %s16_s13  ;;  %s28_s16 = int_to_ptr.hbm [resolvable:$true] %s27_s16 }
   0x4   :  { %s228_s17 = smov 128   ;;  %s229_s18 = smov 8  }
   0x5   :  { %22 = dma.hbm_to_vmem [thread:$0]  %s15_s11, 256, %s17_s13, [#allocation4], %s228_s17, %s228_s17, %s229_s18  }
   0x6   :  { %s230_s19 = smov [#allocation6]  }
   0x7   :  { %s29_s20 = sshll.u32 %s230_s19, 4  ;;  %s30_s20 = int_to_ptr.vmem [resolvable:$true] %s29_s20 }
   0x8   :  { %35 = dma.hbm_to_vmem [thread:$0]  %s28_s16, 2048, %s30_s20, [#allocation7], %s228_s17, %s228_s17, %s229_s18  }
   0x9   :  { %221 = dma.done.wait [#allocation4], 256  }
   0xa   :  { %222 = vsyncadd [#allocation4], 4294967040 }
   0xb   :  { %223 = dma.done.wait [#allocation7], 2048  }
   0xc   :  { %224 = vsyncadd [#allocation7], 4294965248  ;;  %v61_v0 = vld [vmem:[#allocation6 + $0x78] sm:$0xff]  ;;  %v60_v1 = vld [vmem:[#allocation6 + $0x70] sm:$0xff]  ;;  %s231_s0 = smov [#allocation8]   ;;  %s114_s23 = sshll.u32 %s267_s2, 4  ;;  %s115_s23 = int_to_ptr.hbm [resolvable:$true] %s114_s23 }
   0xd   :  { %62 = vmatpush.msra.mxu0 %v61_v0  ;;  %128 = vmatpush.msra.mxu1 %v61_v0  ;;  %v59_v2 = vld [vmem:[#allocation6 + $0x68] sm:$0xff]  ;;  %v58_v3 = vld [vmem:[#allocation6 + $0x60] sm:$0xff]  ;;  %v57_v4 = vld [vmem:[#allocation6 + $0x58] sm:$0xff]  ;;  %s112_s1 = sshll.u32 %s231_s0, 4  ;;  %s113_s1 = int_to_ptr.vmem [resolvable:$true] %s112_s1 }
   0xe   :  { %v56_v5 = vld [vmem:[#allocation6 + $0x50] sm:$0xff]  ;;  %v55_v6 = vld [vmem:[#allocation6 + $0x48] sm:$0xff]  ;;  %v54_v7 = vld [vmem:[#allocation6 + $0x40] sm:$0xff] }
   0xf   :  { %63 = vmatpush.msra.mxu0 %v60_v1  ;;  %129 = vmatpush.msra.mxu1 %v60_v1  ;;  %v53_v8 = vld [vmem:[#allocation6 + $0x38] sm:$0xff]  ;;  %v52_v9 = vld [vmem:[#allocation6 + $0x30] sm:$0xff]  ;;  %v51_v10 = vld [vmem:[#allocation6 + $0x28] sm:$0xff] }
  0x10   :  { %v50_v11 = vld [vmem:[#allocation6 + $0x20] sm:$0xff]  ;;  %v49_v12 = vld [vmem:[#allocation6 + $0x18] sm:$0xff]  ;;  %v48_v13 = vld [vmem:[#allocation6 + $0x10] sm:$0xff] }
  0x11   :  { %64 = vmatpush.msra.mxu0 %v59_v2  ;;  %130 = vmatpush.msra.mxu1 %v59_v2  ;;  %v47_v14 = vld [vmem:[#allocation6 + $0x8] sm:$0xff]  ;;  %v46_v15 = vld [vmem:[#allocation6] sm:$0xff]  ;;  %v44_v16 = vld [vmem:[#allocation3] sm:$0xff] }
  0x12   :  { %v45_v17 = vld [vmem:[#allocation3 + $0x8] sm:$0xff] }
  0x13   :  { %65 = vmatpush.msra.mxu0 %v58_v3  ;;  %131 = vmatpush.msra.mxu1 %v58_v3 }
  0x15   :  { %66 = vmatpush.msra.mxu0 %v57_v4  ;;  %132 = vmatpush.msra.mxu1 %v57_v4 }
  0x17   :  { %67 = vmatpush.msra.mxu0 %v56_v5  ;;  %133 = vmatpush.msra.mxu1 %v56_v5 }
  0x19   :  { %68 = vmatpush.msra.mxu0 %v55_v6  ;;  %134 = vmatpush.msra.mxu1 %v55_v6 }
  0x1b   :  { %69 = vmatpush.msra.mxu0 %v54_v7  ;;  %135 = vmatpush.msra.mxu1 %v54_v7 }
  0x1d   :  { %70 = vmatpush.msra.mxu0 %v53_v8  ;;  %136 = vmatpush.msra.mxu1 %v53_v8 }
  0x1f   :  { %71 = vmatpush.msra.mxu0 %v52_v9  ;;  %137 = vmatpush.msra.mxu1 %v52_v9 }
  0x21   :  { %72 = vmatpush.msra.mxu0 %v51_v10  ;;  %138 = vmatpush.msra.mxu1 %v51_v10 }
  0x23   :  { %73 = vmatpush.msra.mxu0 %v50_v11  ;;  %139 = vmatpush.msra.mxu1 %v50_v11 }
  0x25   :  { %74 = vmatpush.msra.mxu0 %v49_v12  ;;  %140 = vmatpush.msra.mxu1 %v49_v12 }
  0x27   :  { %75 = vmatpush.msra.mxu0 %v48_v13  ;;  %141 = vmatpush.msra.mxu1 %v48_v13 }
  0x29   :  { %76 = vmatpush.msra.mxu0 %v47_v14  ;;  %142 = vmatpush.msra.mxu1 %v47_v14 }
  0x2b   :  { %77 = vmatpush.msra.mxu0 %v46_v15  ;;  %143 = vmatpush.msra.mxu1 %v46_v15 }
  0x2c   :  { %78 = vmatmul.f32.vlgmr.msra.gmra.mxu0 %v44_v16  ;;  %81 = vmatmul.f32.vlgmr.msra.gmra.mxu1 %v45_v17 }
  0xa9   :  { %v79_v18 = vpop.f32.mrf.mxu0  ;;  %v82_v19 = vpop.f32.mrf.mxu1 }
  0xaa   :  { %106 = vst [vmem:[#allocation8] sm:$0xff] %v79_v18 }
  0xab   :  { %107 = vst [vmem:[#allocation8 + $0x8] sm:$0xff] %v82_v19 }
  0xac   :  { %120 = dma.vmem_to_hbm [thread:$0]  %s113_s1, 256, %s115_s23, [#allocation5], %s228_s17, %s228_s17, %s229_s18  }
  0xad   :  { %225 = dma.done.wait [#allocation5], 256  }
  0xae   :  { %226 = vsyncadd [#allocation5], 4294967040 }
  0xaf   :  { %125 = vsyncpa [#allocation4], 1 }
  0xb0   :  { %126 = vsyncpa [#allocation7], 1 }
  0xb1   :  { %127 = vsyncpa [#allocation5], 1 }

</bundles_post_ra>
